<compile_context>
chip_gen: v6e
topology: v6e:2x2x1
jax: 0.10.0
libtpu: 0.0.40
codegen_flags: <defaults>
</compile_context>

<pallas_src>
import jax
import jax.numpy as jnp
from jax.experimental import pallas as pl
from jax.experimental.pallas import tpu as pltpu


def _attn_kernel(x_ref, w1_ref, b1_ref, w2_ref, o_ref):
    # x_ref : (TB, S*H)      TB batch rows, each row = concat of S positions
    # w1_ref: (S*H, S*24)    block-diagonal copy of Linear(H,24) weight
    # b1_ref: (1, S*24)      Linear(H,24) bias tiled S times (f32)
    # w2_ref: (S*24, S)      block-diagonal copy of Linear(24,1) weight
    # o_ref : (TB, S)        softmax attention weights, seq on lanes
    x = x_ref[...]                                           # native dtype

    # Linear(H,24) per sequence position, one big MXU matmul (f32 accumulate).
    h = jnp.dot(x, w1_ref[...], preferred_element_type=jnp.float32) + b1_ref[...]
    h = jnp.maximum(h, 0.0)                                  # (TB, S*24) f32, VPU

    # Linear(24,1) per position -> scores land directly as (TB, S): no reshape,
    # no sublane->lane relayout inside the kernel.
    scores = jnp.dot(h.astype(w2_ref.dtype), w2_ref[...],
                     preferred_element_type=jnp.float32)     # (TB, S)

    # Numerically-stable softmax over the sequence axis (last-axis reductions
    # on lanes; exp on the EUP).  Exact normalization so rows sum to 1.
    m = jnp.max(scores, axis=-1, keepdims=True)
    e = jnp.exp(scores - m)
    denom = jnp.sum(e, axis=-1, keepdims=True)
    o_ref[...] = (e / denom).astype(o_ref.dtype)


def _block_diag(w, s):
    """Stack `w` (in_dim, out_dim) s times along the diagonal -> (s*in, s*out)."""
    i_dim, o_dim = w.shape
    eye = jnp.eye(s, dtype=w.dtype)
    blk = eye[:, None, :, None] * w[None, :, None, :]        # (s, in, s, out)
    return blk.reshape(s * i_dim, s * o_dim)


def _choose_batch_tile(B, S, H, itemsize, target_bytes=6 * 1024 * 1024):
    """Batch elements per grid step.

    VMEM accounting includes lane padding: a (tb, S*H) block occupies
    tb * roundup(S*H, 128) * itemsize bytes in VMEM.  target_bytes (~6 MiB per
    input buffer) keeps 2x input + 2x output + f32 temporaries + weights well
    under the explicit 48 MiB vmem limit (fits v7x's 64 MiB physical VMEM and
    v5e/v6e with room to spare), while staying big enough to amortize the
    ~0.35 us per-step overhead and reach HBM roofline."""
    lane_width = ((S * H + 127) // 128) * 128                # lane-padded row
    per_b = max(1, lane_width * itemsize)
    tb = max(1, min(target_bytes // per_b, B))
    if tb < B:
        tb = max(8, (tb // 8) * 8)                           # 8-sublane aligned tiles
    return int(tb)


def attn_forward(encoder_outputs, w1, b1, w2, b2):
    """encoder_outputs: [B, S, H] -> attention weights [B, S, 1] (softmax over S)."""
    B, S, H = encoder_outputs.shape
    n_hid = w1.shape[-1]                                     # 24

    x = encoder_outputs                                      # keep native dtype
    dt = x.dtype

    w1 = w1.reshape(H, n_hid)
    b1 = b1.reshape(1, n_hid).astype(jnp.float32)
    w2 = w2.reshape(n_hid, 1)
    del b2  # constant shift of every logit -> softmax-invariant, folded away

    # Block-diagonal weights (built once wrapper-side; tiny for small S*H).
    # For large S*H one would switch back to a flattened (TB*S, H) row slab.
    w1_big = _block_diag(w1, S).astype(dt)                   # (S*H, S*24)
    b1_big = jnp.tile(b1, (1, S))                            # (1, S*24) f32
    w2_big = _block_diag(w2, S).astype(dt)                   # (S*24, S)

    x_flat = x.reshape(B, S * H)                             # free XLA reshape

    tb = _choose_batch_tile(B, S, H, jnp.dtype(dt).itemsize)
    grid = (pl.cdiv(B, tb),)                                 # ragged B: partial last
                                                             # block, no jnp.pad copy

    out = pl.pallas_call(
        _attn_kernel,
        out_shape=jax.ShapeDtypeStruct((B, S), dt),
        grid_spec=pltpu.PrefetchScalarGridSpec(
            num_scalar_prefetch=0,
            grid=grid,
            in_specs=[
                pl.BlockSpec((tb, S * H), lambda i: (i, 0)),        # batch rows
                pl.BlockSpec((S * H, S * n_hid), lambda i: (0, 0)),  # W1big (resident)
                pl.BlockSpec((1, S * n_hid), lambda i: (0, 0)),      # b1big
                pl.BlockSpec((S * n_hid, S), lambda i: (0, 0)),      # W2big (resident)
            ],
            out_specs=pl.BlockSpec((tb, S), lambda i: (i, 0)),       # lane-dense
        ),
        compiler_params=pltpu.CompilerParams(
            # single batch axis is independent -> megacore split on v7x
            # (if the trace shows one idle TC, switch to pltpu.CORE_PARALLEL)
            dimension_semantics=("parallel",),
            vmem_limit_bytes=48 * 1024 * 1024,
        ),
    )(x_flat, w1_big, b1_big, w2_big)

    return out[..., None]                                    # (B, S, 1)


if __name__ == "__main__":
    # Small shapes consistent with the module: batch=2, seq=8, h_dim=32
    B, S, H = 2, 8, 32

    key = jax.random.PRNGKey(0)
    kx, kw1, kb1, kw2, kb2 = jax.random.split(key, 5)

    encoder_outputs = jax.random.normal(kx, (B, S, H), dtype=jnp.float32)

    # Deterministic parameter init (uniform, PyTorch-Linear-like bounds)
    bound1 = 1.0 / (H ** 0.5)
    w1 = jax.random.uniform(kw1, (H, 24), jnp.float32, -bound1, bound1)
    b1 = jax.random.uniform(kb1, (24,), jnp.float32, -bound1, bound1)
    bound2 = 1.0 / (24 ** 0.5)
    w2 = jax.random.uniform(kw2, (24, 1), jnp.float32, -bound2, bound2)
    b2 = jax.random.uniform(kb2, (1,), jnp.float32, -bound2, bound2)

    out = attn_forward(encoder_outputs, w1, b1, w2, b2)
    out = jax.block_until_ready(out)

    # Reference in plain JAX (matches the PyTorch module semantics, incl. b2)
    h = jnp.maximum(encoder_outputs.reshape(B * S, H) @ w1 + b1, 0.0)
    logits = (h @ w2 + b2).reshape(B, S)
    ref = jax.nn.softmax(logits, axis=1)[..., None]

    assert out.shape == (B, S, 1)
    # Exact normalization now (no approximate reciprocal) -> tight row-sum check
    assert jnp.allclose(jnp.sum(out[..., 0], axis=1), 1.0, atol=1e-4)
    # Tolerance covers MXU default-precision f32 matmul passes on hardware
    assert jnp.allclose(out, ref, atol=3e-3, rtol=3e-3)

    print("KERNEL_OK")
</pallas_src>

<mosaic_0001>
module attributes {stable_mosaic.version = 11 : i64} {
  func.func @_attn_kernel(%arg0: i32, %arg1: memref<2x256xf32, #tpu.memory_space<vmem>>, %arg2: memref<256x192xf32, #tpu.memory_space<vmem>>, %arg3: memref<1x192xf32, #tpu.memory_space<vmem>>, %arg4: memref<192x8xf32, #tpu.memory_space<vmem>>, %arg5: memref<2x8xf32, #tpu.memory_space<vmem>>) attributes {dimension_semantics = [#tpu.dimension_semantics<parallel>], iteration_bounds = array<i64: 1>, scalar_prefetch = 0 : i64, scratch_operands = 0 : i64, tpu.core_type = #tpu.core_type<tc>, window_params = [{transform_indices = @transform_0, window_bounds = array<i64: 2, 256>}, {pipeline_mode = #tpu.pipeline_mode<synchronous>, transform_indices = @transform_1, window_bounds = array<i64: 256, 192>}, {pipeline_mode = #tpu.pipeline_mode<synchronous>, transform_indices = @transform_2, window_bounds = array<i64: 1, 192>}, {pipeline_mode = #tpu.pipeline_mode<synchronous>, transform_indices = @transform_3, window_bounds = array<i64: 192, 8>}, {transform_indices = @transform_4, window_bounds = array<i64: 2, 8>}]} {
    %c0 = arith.constant 0 : index
    %c0_0 = arith.constant 0 : index
    %0 = vector.load %arg1[%c0, %c0_0] : memref<2x256xf32, #tpu.memory_space<vmem>>, vector<2x256xf32>
    %c0_1 = arith.constant 0 : index
    %c0_2 = arith.constant 0 : index
    %1 = vector.load %arg2[%c0_1, %c0_2] : memref<256x192xf32, #tpu.memory_space<vmem>>, vector<256x192xf32>
    %cst = arith.constant dense<0.000000e+00> : vector<2x192xf32>
    %2 = tpu.matmul %0, %1, %cst {dimension_numbers = #tpu.dot_dimension_numbers<[1], [0], [0], [1], [0, 0, 1, 1], [], []>} : vector<2x256xf32>, vector<256x192xf32>, vector<2x192xf32> -> vector<2x192xf32>
    %c0_3 = arith.constant 0 : index
    %c0_4 = arith.constant 0 : index
    %3 = vector.load %arg3[%c0_3, %c0_4] : memref<1x192xf32, #tpu.memory_space<vmem>>, vector<1x192xf32>
    %4 = vector.broadcast %3 : vector<1x192xf32> to vector<2x192xf32>
    %5 = arith.addf %2, %4 : vector<2x192xf32>
    %cst_5 = arith.constant 0.000000e+00 : f32
    %6 = vector.broadcast %cst_5 : f32 to vector<2x192xf32>
    %7 = arith.maximumf %5, %6 : vector<2x192xf32>
    %c0_6 = arith.constant 0 : index
    %c0_7 = arith.constant 0 : index
    %8 = vector.load %arg4[%c0_6, %c0_7] : memref<192x8xf32, #tpu.memory_space<vmem>>, vector<192x8xf32>
    %cst_8 = arith.constant dense<0.000000e+00> : vector<2x8xf32>
    %9 = tpu.matmul %7, %8, %cst_8 {dimension_numbers = #tpu.dot_dimension_numbers<[1], [0], [0], [1], [0, 0, 1, 1], [], []>} : vector<2x192xf32>, vector<192x8xf32>, vector<2x8xf32> -> vector<2x8xf32>
    %cst_9 = arith.constant dense<0xFF800000> : vector<2xf32>
    %10 = vector.multi_reduction <maximumf>, %9, %cst_9 [1] : vector<2x8xf32> to vector<2xf32>
    %11 = vector.shape_cast %10 : vector<2xf32> to vector<2x1xf32>
    %12 = vector.broadcast %11 : vector<2x1xf32> to vector<2x8xf32>
    %13 = arith.subf %9, %12 : vector<2x8xf32>
    %14 = math.exp %13 : vector<2x8xf32>
    %cst_10 = arith.constant dense<0.000000e+00> : vector<2xf32>
    %15 = vector.multi_reduction <add>, %14, %cst_10 [1] : vector<2x8xf32> to vector<2xf32>
    %16 = vector.shape_cast %15 : vector<2xf32> to vector<2x1xf32>
    %17 = vector.broadcast %16 : vector<2x1xf32> to vector<2x8xf32>
    %18 = arith.divf %14, %17 : vector<2x8xf32>
    %c0_11 = arith.constant 0 : index
    %c0_12 = arith.constant 0 : index
    %19 = vector.load %arg5[%c0_11, %c0_12] : memref<2x8xf32, #tpu.memory_space<vmem>>, vector<2x8xf32>
    tpu.vector_store %arg5[%c0_11, %c0_12], %18 {strides = array<i32>} : memref<2x8xf32, #tpu.memory_space<vmem>>, vector<2x8xf32>,
    return
  }
  func.func @transform_0(%arg0: i32) -> (i32, i32) {
    %c0_i32 = arith.constant 0 : i32
    %c0_i32_0 = arith.constant 0 : i32
    return %arg0, %c0_i32 : i32, i32
  }
  func.func @transform_1(%arg0: i32) -> (i32, i32) {
    %c0_i32 = arith.constant 0 : i32
    %c0_i32_0 = arith.constant 0 : i32
    %c0_i32_1 = arith.constant 0 : i32
    return %c0_i32, %c0_i32_0 : i32, i32
  }
  func.func @transform_2(%arg0: i32) -> (i32, i32) {
    %c0_i32 = arith.constant 0 : i32
    %c0_i32_0 = arith.constant 0 : i32
    %c0_i32_1 = arith.constant 0 : i32
    return %c0_i32, %c0_i32_0 : i32, i32
  }
  func.func @transform_3(%arg0: i32) -> (i32, i32) {
    %c0_i32 = arith.constant 0 : i32
    %c0_i32_0 = arith.constant 0 : i32
    %c0_i32_1 = arith.constant 0 : i32
    return %c0_i32, %c0_i32_0 : i32, i32
  }
  func.func @transform_4(%arg0: i32) -> (i32, i32) {
    %c0_i32 = arith.constant 0 : i32
    %c0_i32_0 = arith.constant 0 : i32
    return %arg0, %c0_i32 : i32, i32
  }
}

</mosaic_0001>

<bundles_post_ra>
// kernel: tpu_custom_call.1
= control target key start
LH: loop header
LB: loop body
LE: loop exit
PB: predicated region body
PF: predicated region fallthrough
CT: control target
= control target key end

     0   :  { %v334_v4 = vmov 0.0   ;;  %s666_s0 = inlined_call_operand.vmem [shape: f32[2,256], index: 0, kind: input, shape index: {}]   ;;  %s667_s1 = inlined_call_operand.vmem [shape: f32[256,192], index: 1, kind: input, shape index: {}]   ;;  %s668_s2 = inlined_call_operand.vmem [shape: f32[1,192], index: 2, kind: input, shape index: {}]   ;;  %s669_s3 = inlined_call_operand.vmem [shape: f32[192,8], index: 3, kind: input, shape index: {}]   ;;  %s670_s4 = inlined_call_operand.hbm [shape: f32[2,8], index: 4, kind: output, shape index: {}]  }
   0x1   :  { %v50_v0 = vld [vmem:[%s667_s1 + $0xf8] sm:$0xff]  ;;  %v49_v1 = vld [vmem:[%s667_s1 + $0xf0] sm:$0xff]  ;;  %v48_v2 = vld [vmem:[%s667_s1 + $0xe8] sm:$0xff]  ;;  %207 = vmatprep.subr.mxu1 %v334_v4 }
   0x2   :  { %106 = vmatprep.subr.mxu0 %v50_v0  ;;  %v47_v3 = vld [vmem:[%s667_s1 + $0xe0] sm:$0xff]  ;;  %v46_v5 = vld [vmem:[%s667_s1 + $0xd8] sm:$0xff]  ;;  %v45_v6 = vld [vmem:[%s667_s1 + $0xd0] sm:$0xff] }
   0x3   :  { %107 = vmatpush1.msra.mxu0 %v49_v1  ;;  %v44_v7 = vld [vmem:[%s667_s1 + $0xc8] sm:$0xff]  ;;  %v43_v8 = vld [vmem:[%s667_s1 + $0xc0] sm:$0xff]  ;;  %v42_v9 = vld [vmem:[%s667_s1 + $0xb8] sm:$0xff] }
   0x4   :  { %108 = vmatprep.subr.mxu0 %v48_v2  ;;  %v41_v10 = vld [vmem:[%s667_s1 + $0xb0] sm:$0xff]  ;;  %v40_v11 = vld [vmem:[%s667_s1 + $0xa8] sm:$0xff]  ;;  %v39_v12 = vld [vmem:[%s667_s1 + $0xa0] sm:$0xff] }
   0x5   :  { %109 = vmatpush1.msra.mxu0 %v47_v3  ;;  %v38_v13 = vld [vmem:[%s667_s1 + $0x98] sm:$0xff]  ;;  %v37_v14 = vld [vmem:[%s667_s1 + $0x90] sm:$0xff]  ;;  %v36_v15 = vld [vmem:[%s667_s1 + $0x88] sm:$0xff] }
   0x6   :  { %110 = vmatprep.subr.mxu0 %v46_v5  ;;  %v35_v16 = vld [vmem:[%s667_s1 + $0x80] sm:$0xff]  ;;  %v34_v17 = vld [vmem:[%s667_s1 + $0x78] sm:$0xff]  ;;  %v33_v18 = vld [vmem:[%s667_s1 + $0x70] sm:$0xff] }
   0x7   :  { %111 = vmatpush1.msra.mxu0 %v45_v6  ;;  %v32_v19 = vld [vmem:[%s667_s1 + $0x68] sm:$0xff]  ;;  %v31_v20 = vld [vmem:[%s667_s1 + $0x60] sm:$0xff]  ;;  %v30_v21 = vld [vmem:[%s667_s1 + $0x58] sm:$0xff] }
   0x8   :  { %112 = vmatprep.subr.mxu0 %v44_v7  ;;  %v29_v22 = vld [vmem:[%s667_s1 + $0x50] sm:$0xff]  ;;  %v28_v23 = vld [vmem:[%s667_s1 + $0x48] sm:$0xff]  ;;  %v27_v24 = vld [vmem:[%s667_s1 + $0x40] sm:$0xff] }
   0x9   :  { %113 = vmatpush1.msra.mxu0 %v43_v8  ;;  %v437_v25 = vld.sshfl [vmem:[%s666_s0] sm:$0x33 pattern:$0x76325410]  ;;  %v194_v26 = vld [vmem:[%s669_s3 + $0x78] sm:$0xff]  ;;  %v193_v29 = vld [vmem:[%s669_s3 + $0x70] sm:$0xff] }
   0xa   :  { %114 = vmatprep.subr.mxu0 %v42_v9  ;;  %v26_v27 = vld [vmem:[%s667_s1 + $0x38] sm:$0xff]  ;;  %v103_v28 = vcombine.high %v437_v25, %v437_v25  ;;  %208 = vmatpush1.msra.mxu1 %v194_v26  ;;  %v25_v30 = vld [vmem:[%s667_s1 + $0x30] sm:$0xff]  ;;  %v24_v31 = vld [vmem:[%s667_s1 + $0x28] sm:$0xff] }
   0xb   :  { %115 = vmatpush1.msra.mxu0 %v41_v10  ;;  %209 = vmatprep.subr.mxu1 %v334_v4  ;;  %v192_v32 = vld [vmem:[%s669_s3 + $0x68] sm:$0xff]  ;;  %v23_v33 = vld [vmem:[%s667_s1 + $0x20] sm:$0xff]  ;;  %v22_v34 = vld [vmem:[%s667_s1 + $0x18] sm:$0xff] }
   0xc   :  { %116 = vmatprep.subr.mxu0 %v40_v11  ;;  %170 = vmatprep.mubr.f32.mxu0 %v103_v28  ;;  %v191_v35 = vld [vmem:[%s669_s3 + $0x60] sm:$0xff]  ;;  %v21_v36 = vld [vmem:[%s667_s1 + $0x10] sm:$0xff]  ;;  %v20_v37 = vld [vmem:[%s667_s1 + $0x8] sm:$0xff] }
   0xd   :  { %117 = vmatpush1.msra.mxu0 %v39_v12  ;;  %210 = vmatpush1.msra.mxu1 %v193_v29  ;;  %v190_v38 = vld [vmem:[%s669_s3 + $0x58] sm:$0xff] }
   0xe   :  { %118 = vmatprep.subr.mxu0 %v38_v13  ;;  %211 = vmatprep.subr.mxu1 %v334_v4 }
   0xf   :  { %119 = vmatpush1.msra.mxu0 %v37_v14  ;;  %212 = vmatpush1.msra.mxu1 %v192_v32 }
  0x10   :  { %120 = vmatprep.subr.mxu0 %v36_v15  ;;  %213 = vmatprep.subr.mxu1 %v334_v4 }
  0x11   :  { %121 = vmatpush1.msra.mxu0 %v35_v16 }
  0x12   :  { %122 = vmatprep.subr.mxu0 %v34_v17 }
  0x13   :  { %123 = vmatpush1.msra.mxu0 %v33_v18 }
  0x14   :  { %124 = vmatprep.subr.mxu0 %v32_v19 }
  0x15   :  { %125 = vmatpush1.msra.mxu0 %v31_v20 }
  0x16   :  { %126 = vmatprep.subr.mxu0 %v30_v21 }
  0x17   :  { %127 = vmatpush1.msra.mxu0 %v29_v22 }
  0x18   :  { %128 = vmatprep.subr.mxu0 %v28_v23 }
  0x19   :  { %129 = vmatpush1.msra.mxu0 %v27_v24 }
  0x1a   :  { %130 = vmatprep.subr.mxu0 %v26_v27 }
  0x1b   :  { %131 = vmatpush1.msra.mxu0 %v25_v30 }
  0x1c   :  { %132 = vmatprep.subr.mxu0 %v24_v31 }
  0x1d   :  { %133 = vmatpush1.msra.mxu0 %v23_v33 }
  0x1e   :  { %9 = vsyncpa [#allocation3], 0  ;;  %134 = vmatprep.subr.mxu0 %v22_v34  ;;  %v19_v39 = vld [vmem:[%s667_s1] sm:$0xff]  ;;  %214 = vmatpush1.msra.mxu1 %v191_v35  ;;  %v82_v40 = vld [vmem:[%s667_s1 + $0x1f8] sm:$0xff]  ;;  %v85_v28 = vlaneseq  ;;  %vm203_vm0 = vcmask 523264   ;;  %vm277_vm1 = vcmask 58368  }
  0x1f   :  { %135 = vmatpush1.msra.mxu0 %v21_v36  ;;  %215 = vmatprep.subr.mxu1 %v334_v4  ;;  %v189_v41 = vld [vmem:[%s669_s3 + $0x50] sm:$0xff]  ;;  %v80_v43 = vld [vmem:[%s667_s1 + $0x1e8] sm:$0xff]  ;;  %v79_v45 = vld [vmem:[%s667_s1 + $0x1e0] sm:$0xff] }
  0x20   :  { %136 = vmatprep.subr.mxu0 %v20_v37  ;;  %v81_v42 = vld [vmem:[%s667_s1 + $0x1f0] sm:$0xff]  ;;  %216 = vmatpush1.msra.mxu1 %v190_v38  ;;  %v188_v44 = vld [vmem:[%s669_s3 + $0x48] sm:$0xff]  ;;  %v78_v46 = vld [vmem:[%s667_s1 + $0x1d8] sm:$0xff]  ;;  %v86_v29 = vshrl.u32 %v85_v28, 7 }
  0x21   :  { %137 = vmatpush1.msra.mxu0 %v19_v39  ;;  %217 = vmatprep.subr.mxu1 %v334_v4  ;;  %v187_v47 = vld [vmem:[%s669_s3 + $0x40] sm:$0xff]  ;;  %v77_v48 = vld [vmem:[%s667_s1 + $0x1d0] sm:$0xff]  ;;  %v76_v49 = vld [vmem:[%s667_s1 + $0x1c8] sm:$0xff] }
  0x22   :  { %138 = vmatprep.subr.mxu0 %v82_v40  ;;  %218 = vmatpush1.msra.mxu1 %v189_v41  ;;  %v186_v50 = vld [vmem:[%s669_s3 + $0x38] sm:$0xff]  ;;  %v75_v51 = vld [vmem:[%s667_s1 + $0x1c0] sm:$0xff]  ;;  %v185_v53 = vld [vmem:[%s669_s3 + $0x30] sm:$0xff]  ;;  %v87_v30 = vsub.s32 0, %v86_v29  ;;  %v91_v32 = vsub.s32 1, %v86_v29 }
  0x23   :  { %139 = vmatpush2.msra.mxu0 %v81_v42  ;;  %219 = vmatprep.subr.mxu1 %v334_v4  ;;  %v74_v52 = vld [vmem:[%s667_s1 + $0x1b8] sm:$0xff]  ;;  %v73_v54 = vld [vmem:[%s667_s1 + $0x1b0] sm:$0xff]  ;;  %v72_v55 = vld [vmem:[%s667_s1 + $0x1a8] sm:$0xff] }
  0x24   :  { %140 = vmatprep.subr.mxu0 %v80_v43  ;;  %220 = vmatpush1.msra.mxu1 %v188_v44  ;;  %v184_v56 = vld [vmem:[%s669_s3 + $0x28] sm:$0xff]  ;;  %v71_v57 = vld [vmem:[%s667_s1 + $0x1a0] sm:$0xff]  ;;  %v70_v58 = vld [vmem:[%s667_s1 + $0x198] sm:$0xff] }
  0x25   :  { %141 = vmatpush2.msra.mxu0 %v79_v45  ;;  %221 = vmatprep.subr.mxu1 %v334_v4  ;;  %v183_v59 = vld [vmem:[%s669_s3 + $0x20] sm:$0xff]  ;;  %v69_v60 = vld [vmem:[%s667_s1 + $0x190] sm:$0xff]  ;;  %v68_v61 = vld [vmem:[%s667_s1 + $0x188] sm:$0xff] }
  0x26   :  { %142 = vmatprep.subr.mxu0 %v78_v46  ;;  %222 = vmatpush1.msra.mxu1 %v187_v47  ;;  %v182_v62 = vld [vmem:[%s669_s3 + $0x18] sm:$0xff]  ;;  %v67_v63 = vld [vmem:[%s667_s1 + $0x180] sm:$0xff]  ;;  %v181_v1 = vld [vmem:[%s669_s3 + $0x10] sm:$0xff] }
  0x27   :  { %143 = vmatpush2.msra.mxu0 %v77_v48  ;;  %223 = vmatprep.subr.mxu1 %v334_v4  ;;  %v66_v0 = vld [vmem:[%s667_s1 + $0x178] sm:$0xff]  ;;  %v65_v2 = vld [vmem:[%s667_s1 + $0x170] sm:$0xff]  ;;  %v64_v3 = vld [vmem:[%s667_s1 + $0x168] sm:$0xff] }
  0x28   :  { %144 = vmatprep.subr.mxu0 %v76_v49  ;;  %224 = vmatpush1.msra.mxu1 %v186_v50  ;;  %v180_v5 = vld [vmem:[%s669_s3 + $0x8] sm:$0xff]  ;;  %v63_v6 = vld [vmem:[%s667_s1 + $0x160] sm:$0xff]  ;;  %v62_v7 = vld [vmem:[%s667_s1 + $0x158] sm:$0xff] }
  0x29   :  { %145 = vmatpush2.msra.mxu0 %v75_v51  ;;  %225 = vmatprep.subr.mxu1 %v334_v4  ;;  %v179_v8 = vld [vmem:[%s669_s3] sm:$0xff]  ;;  %v61_v9 = vld [vmem:[%s667_s1 + $0x150] sm:$0xff]  ;;  %v60_v10 = vld [vmem:[%s667_s1 + $0x148] sm:$0xff] }
  0x2a   :  { %146 = vmatprep.subr.mxu0 %v74_v52  ;;  %226 = vmatpush1.msra.mxu1 %v185_v53  ;;  %v202_v11 = vld [vmem:[%s669_s3 + $0xb8] sm:$0xff]  ;;  %v59_v12 = vld [vmem:[%s667_s1 + $0x140] sm:$0xff]  ;;  %v201_v14 = vld [vmem:[%s669_s3 + $0xb0] sm:$0xff] }
  0x2b   :  { %147 = vmatpush2.msra.mxu0 %v73_v54  ;;  %227 = vmatprep.subr.mxu1 %v334_v4  ;;  %v58_v13 = vld [vmem:[%s667_s1 + $0x138] sm:$0xff]  ;;  %v57_v15 = vld [vmem:[%s667_s1 + $0x130] sm:$0xff]  ;;  %v56_v16 = vld [vmem:[%s667_s1 + $0x128] sm:$0xff] }
  0x2c   :  { %148 = vmatprep.subr.mxu0 %v72_v55  ;;  %228 = vmatpush1.msra.mxu1 %v184_v56  ;;  %v200_v17 = vld [vmem:[%s669_s3 + $0xa8] sm:$0xff]  ;;  %v55_v18 = vld [vmem:[%s667_s1 + $0x120] sm:$0xff]  ;;  %v54_v19 = vld [vmem:[%s667_s1 + $0x118] sm:$0xff] }
  0x2d   :  { %149 = vmatpush2.msra.mxu0 %v71_v57  ;;  %229 = vmatprep.subr.mxu1 %v334_v4  ;;  %v199_v20 = vld [vmem:[%s669_s3 + $0xa0] sm:$0xff]  ;;  %v53_v21 = vld [vmem:[%s667_s1 + $0x110] sm:$0xff]  ;;  %v52_v22 = vld [vmem:[%s667_s1 + $0x108] sm:$0xff] }
  0x2e   :  { %150 = vmatprep.subr.mxu0 %v70_v58  ;;  %230 = vmatpush1.msra.mxu1 %v183_v59  ;;  %v51_v23 = vld [vmem:[%s667_s1 + $0x100] sm:$0xff]  ;;  %v198_v24 = vld [vmem:[%s669_s3 + $0x98] sm:$0xff]  ;;  %v197_v26 = vld [vmem:[%s669_s3 + $0x90] sm:$0xff] }
  0x2f   :  { %151 = vmatpush2.msra.mxu0 %v69_v60  ;;  %231 = vmatprep.subr.mxu1 %v334_v4  ;;  %v196_v27 = vld [vmem:[%s669_s3 + $0x88] sm:$0xff]  ;;  %v83_v31 = vld [vmem:[%s668_s2] sm:$0x3]  ;;  %s335_s2 = smov [#allocation2]  }
  0x30   :  { %152 = vmatprep.subr.mxu0 %v68_v61  ;;  %232 = vmatpush1.msra.mxu1 %v182_v62  ;;  %v88_v33 = vrot.slane %v83_v31, %v87_v30  ;;  %v92_v34 = vrot.slane %v83_v31, %v91_v32 }
  0x31   :  { %153 = vmatpush2.msra.mxu0 %v67_v63  ;;  %233 = vmatprep.subr.mxu1 %v334_v4 }
  0x32   :  { %154 = vmatprep.subr.mxu0 %v66_v0  ;;  %234 = vmatpush1.msra.mxu1 %v181_v1 }
  0x33   :  { %155 = vmatpush2.msra.mxu0 %v65_v2  ;;  %235 = vmatprep.subr.mxu1 %v334_v4 }
  0x34   :  { %156 = vmatprep.subr.mxu0 %v64_v3  ;;  %236 = vmatpush1.msra.mxu1 %v180_v5 }
  0x35   :  { %157 = vmatpush2.msra.mxu0 %v63_v6  ;;  %237 = vmatprep.subr.mxu1 %v334_v4 }
  0x36   :  { %158 = vmatprep.subr.mxu0 %v62_v7  ;;  %238 = vmatpush1.msra.mxu1 %v179_v8 }
  0x37   :  { %159 = vmatpush2.msra.mxu0 %v61_v9  ;;  %255 = vmatprep.subr.mxu1 %v334_v4 }
  0x38   :  { %160 = vmatprep.subr.mxu0 %v60_v10  ;;  %256 = vmatpush2.msra.mxu1 %v202_v11 }
  0x39   :  { %161 = vmatpush2.msra.mxu0 %v59_v12  ;;  %257 = vmatprep.subr.mxu1 %v334_v4 }
  0x3a   :  { %162 = vmatprep.subr.mxu0 %v58_v13  ;;  %258 = vmatpush2.msra.mxu1 %v201_v14 }
  0x3b   :  { %163 = vmatpush2.msra.mxu0 %v57_v15  ;;  %259 = vmatprep.subr.mxu1 %v334_v4 }
  0x3c   :  { %164 = vmatprep.subr.mxu0 %v56_v16  ;;  %260 = vmatpush2.msra.mxu1 %v200_v17 }
  0x3d   :  { %165 = vmatpush2.msra.mxu0 %v55_v18  ;;  %261 = vmatprep.subr.mxu1 %v334_v4 }
  0x3e   :  { %166 = vmatprep.subr.mxu0 %v54_v19  ;;  %262 = vmatpush2.msra.mxu1 %v199_v20 }
  0x3f   :  { %167 = vmatpush2.msra.mxu0 %v53_v21  ;;  %263 = vmatprep.subr.mxu1 %v334_v4 }
  0x40   :  { %168 = vmatprep.subr.mxu0 %v52_v22  ;;  %264 = vmatpush2.msra.mxu1 %v198_v24 }
  0x41   :  { %169 = vmatpush2.msra.mxu0 %v51_v23  ;;  %265 = vmatprep.subr.mxu1 %v334_v4 }
  0x42   :  { %171 = vmatmul.mubr.f32.vlgmr.msra.gmra.mxu0 %v437_v25  ;;  %266 = vmatpush2.msra.mxu1 %v197_v26  ;;  %v195_v25 = vld [vmem:[%s669_s3 + $0x80] sm:$0xff]  ;;  %s296_s3 = sshll.u32 %s335_s2, 4  ;;  %s297_s3 = int_to_ptr.vmem [resolvable:$true] %s296_s3 }
  0x43   :  { %267 = vmatprep.subr.mxu1 %v334_v4  ;;  %s312_s7 = scalar_lea.vmem %s297_s3, 32  ;;  %p317_p1 = scmp.lt.s32.totalorder %s297_s3, %s297_s3 }
  0x44   :  { %268 = vmatpush2.msra.mxu1 %v196_v27  ;;  %p313_p0 = scmp.ne.s32.totalorder %s297_s3, %s312_s7  ;;  %p318_p2 = scmp.lt.s32.totalorder %s312_s7, %s312_s7 }
  0x45   :  { %269 = vmatprep.subr.mxu1 %v334_v4 }
  0x46   :  { %270 = vmatpush2.msra.mxu1 %v195_v25  ;;  %p319_p3 = por %p318_p2, %p317_p1 }
  0x48   :  { %p320_p4 = pnand %p319_p3, %p313_p0 }
 0x102   :  { %v172_v35 = vpop.f32.mrf.mxu0 }
 0x103   :  { %v173_v36 = vadd.f32 %v172_v35, %v88_v33 }
 0x104   :  { %v174_v37 = vpop.f32.mrf.mxu0 }
 0x105   :  { %v175_v38 = vadd.f32 %v174_v37, %v92_v34  ;;  %v177_v40 = vmax.f32 %v173_v36, 0.0 }
 0x107   :  { %v178_v39 = vmax.f32 %v175_v38, 0.0 }
 0x109   :  { %305 = vmatprep.mubr.msk.f32.mxu1 %vm203_vm0, %v178_v39 }
 0x10a   :  { %272 = vmatmul.mubr.f32.vlgmr.msra.gmra.mxu1 %v177_v40 }
 0x1ca   :  { %v273_v4 = vpop.f32.mrf.mxu1 }
 0x1cb   :  { %v278_v41 = vsel %vm277_vm1, %v273_v4, -inf }
 0x1cc   :  { %279 = vmax.xlane.f32.xlu0 %v278_v41  ;;  %v275_v42 = vpop.f32.mrf.mxu1 }
 0x255   :  { %v280_v43 = vpop.xlane.xlu0 %279 }
 0x256   :  { %v281_v44 = vsub.f32 %v273_v4, %v280_v43 }
 0x258   :  { %v282_v45 = vmul.f32 1.442695, %v281_v44 }
 0x25a   :  { %308 = vpow2.f32 %v282_v45 }
 0x267   :  { %v309_v46 = vpop.eup %308 }
 0x268   :  { %v284_v47 = vsel %vm277_vm1, %v309_v46, 0.0 }
 0x269   :  { %285 = vadd.xlane.f32.xlu0 %v284_v47 }
 0x2f2   :  { %v286_v48 = vpop.xlane.xlu0 %285 }
 0x2f3   :  { %310 = vrcp.f32 %v286_v48 }
 0x300   :  { %v311_v49 = vpop.eup %310 }
 0x301   :  { %v288_v50 = vmul.f32 %v311_v49, %v309_v46 }
 0x303   :  { %289 = vst.msk [vmem:[#allocation2] sm:$0x3] %vm277_vm1, %v288_v50 }
 0x304   :  { %323 = shalt.err (!%p320_p4)
}
 0x305   :  { %299 = dma.vmem_to_hbm [thread:$0]  %s297_s3, 32, %s670_s4, [#allocation3]  }
 0x306   :  { %332 = dma.done.wait [#allocation3], 32  }
 0x307   :  { %333 = vsyncadd [#allocation3], 4294967264 }
 0x308   :  { %303 = vsyncpa [#allocation3], 1 }

</bundles_post_ra>
